<compile_context>
chip_gen: v7x
topology: tpu7x:2x2x1
jax: 0.10.0
libtpu: 0.0.40
codegen_flags: <defaults>
</compile_context>

<pallas_src>
import functools

import jax
import jax.numpy as jnp
from jax.experimental import pallas as pl
from jax.experimental.pallas import tpu as pltpu

_LANES = 128
_SUBLANES = 8


# ----------------------------------------------------------------------------
# Small-N fast path: single VMEM block, exact two-pass formula, scalar output.
# ----------------------------------------------------------------------------
def _plcc_small_kernel(x_ref, y_ref, out_ref, *, n, n_pad):
    x = x_ref[...].astype(jnp.float32)
    y = y_ref[...].astype(jnp.float32)

    inv_n = jnp.float32(1.0 / n)
    mx = jnp.sum(x) * inv_n          # zero padding does not change raw sums
    my = jnp.sum(y) * inv_n

    xm = x - mx
    ym = y - my

    # Each zero-padded slot contributes exactly (0-mx)*(0-my) etc.; subtract
    # that closed-form correction instead of building an iota mask.
    pad = jnp.float32(n_pad)
    ss_x = jnp.maximum(jnp.sum(xm * xm) - pad * mx * mx, 0.0)
    ss_y = jnp.maximum(jnp.sum(ym * ym) - pad * my * my, 0.0)
    s_xy = jnp.sum(xm * ym) - pad * mx * my

    bias = jnp.float32(1e-8)
    # One scalar divide instead of 2N per-element divides.
    r = s_xy / ((jnp.sqrt(ss_x) + bias) * (jnp.sqrt(ss_y) + bias))
    out_ref[0, 0] = jnp.log(jnp.float32(1.0) - r)


def _plcc_small(p_flat, t_flat, n):
    pad = (-n) % (_SUBLANES * _LANES)
    if pad:  # single jnp.pad, skipped entirely when already aligned
        p_flat = jnp.pad(p_flat, (0, pad))
        t_flat = jnp.pad(t_flat, (0, pad))
    p2 = p_flat.reshape(-1, _LANES)
    t2 = t_flat.reshape(-1, _LANES)

    out = pl.pallas_call(
        functools.partial(_plcc_small_kernel, n=n, n_pad=pad),
        out_shape=jax.ShapeDtypeStruct((1, 1), jnp.float32),
        in_specs=[
            pl.BlockSpec(memory_space=pltpu.VMEM),
            pl.BlockSpec(memory_space=pltpu.VMEM),
        ],
        out_specs=pl.BlockSpec(memory_space=pltpu.SMEM),
        compiler_params=pltpu.CompilerParams(vmem_limit_bytes=64 * 1024 * 1024),
    )(p2, t2)
    return out[0, 0]


# ----------------------------------------------------------------------------
# Large-N tiled path: grid-tiled per-lane (shifted) sufficient statistics.
# ----------------------------------------------------------------------------
def _plcc_stats_kernel(x_ref, y_ref, stats_ref):
    # stats_ref: (8, 128) VMEM-resident accumulator.
    #   rows 0..4 : per-lane sums of xs, ys, xs*xs, ys*ys, xs*ys (shifted vals)
    #   rows 5, 6 : broadcast scalar shifts (mean of the very first data row)
    #   row  7    : unused (keeps the output block a full (8, 128) tile)
    i = pl.program_id(0)

    @pl.when(i == 0)
    def _init():
        stats_ref[...] = jnp.zeros_like(stats_ref)
        # Cheap mean estimate as a shift -> guards the one-pass variance
        # formula against catastrophic cancellation when |mean| >> std.
        x0 = x_ref[0:1, :].astype(jnp.float32)
        y0 = y_ref[0:1, :].astype(jnp.float32)
        stats_ref[5:6, :] = jnp.broadcast_to(
            jnp.mean(x0, axis=1, keepdims=True), (1, _LANES))
        stats_ref[6:7, :] = jnp.broadcast_to(
            jnp.mean(y0, axis=1, keepdims=True), (1, _LANES))

    sx = stats_ref[5:6, :]
    sy = stats_ref[6:7, :]
    x = x_ref[...].astype(jnp.float32) - sx
    y = y_ref[...].astype(jnp.float32) - sy

    # Per-lane partial sums only; no cross-lane work in the hot loop.
    stats_ref[0:1, :] += jnp.sum(x, axis=0, keepdims=True)
    stats_ref[1:2, :] += jnp.sum(y, axis=0, keepdims=True)
    stats_ref[2:3, :] += jnp.sum(x * x, axis=0, keepdims=True)
    stats_ref[3:4, :] += jnp.sum(y * y, axis=0, keepdims=True)
    stats_ref[4:5, :] += jnp.sum(x * y, axis=0, keepdims=True)


def _finalize(s, n):
    """Sufficient statistics (5,) of (shifted) data -> log(1 - r)."""
    fn = jnp.float32(n)
    mx = s[0] / fn
    my = s[1] / fn
    ss_x = jnp.maximum(s[2] - fn * mx * mx, 0.0)
    ss_y = jnp.maximum(s[3] - fn * my * my, 0.0)
    s_xy = s[4] - fn * mx * my
    bias = jnp.float32(1e-8)
    r = s_xy / ((jnp.sqrt(ss_x) + bias) * (jnp.sqrt(ss_y) + bias))
    return jnp.log(jnp.float32(1.0) - r)


def _plcc_tiled(p_flat, t_flat, n, tile_rows):
    rows_true = n // _LANES                      # fully-real (padding-free) rows
    tile_rows = max(_SUBLANES,
                    min(tile_rows, (rows_true // _SUBLANES) * _SUBLANES))
    num_blocks = rows_true // tile_rows
    if num_blocks == 0:                          # defensive: tiny forced inputs
        return _plcc_small(p_flat, t_flat, n)

    rows_main = num_blocks * tile_rows
    n_main = rows_main * _LANES

    # At most ONE jnp.pad (lane alignment only), skipped when aligned. The
    # padded region is never read by the kernel: the grid covers only the
    # first rows_main (real-data) rows.
    lane_pad = (-n) % _LANES
    if lane_pad:
        p_pad = jnp.pad(p_flat, (0, lane_pad))
        t_pad = jnp.pad(t_flat, (0, lane_pad))
    else:
        p_pad, t_pad = p_flat, t_flat
    p2 = p_pad.reshape(-1, _LANES)
    t2 = t_pad.reshape(-1, _LANES)

    stats = pl.pallas_call(
        _plcc_stats_kernel,
        out_shape=jax.ShapeDtypeStruct((_SUBLANES, _LANES), jnp.float32),
        grid_spec=pltpu.PrefetchScalarGridSpec(
            num_scalar_prefetch=0,
            grid=(num_blocks,),
            in_specs=[
                pl.BlockSpec((tile_rows, _LANES), lambda i: (i, 0)),
                pl.BlockSpec((tile_rows, _LANES), lambda i: (i, 0)),
            ],
            out_specs=pl.BlockSpec((_SUBLANES, _LANES), lambda i: (0, 0)),
        ),
        compiler_params=pltpu.CompilerParams(
            dimension_semantics=("arbitrary",),
            # 2 inputs x 2 buffers x ~4 MiB blocks = 16 MiB; 32 MiB limit is
            # explicit (v5e default is only 16 MiB) and safe on v7x's 64 MiB.
            vmem_limit_bytes=32 * 1024 * 1024,
        ),
    )(p2, t2)

    shift_x = stats[5, 0]
    shift_y = stats[6, 0]
    s = jnp.sum(stats[0:5, :], axis=1)           # (5,) shifted sums, main part

    if n_main < n:
        # Ragged tail (< one tile): plain fused JAX on the ORIGINAL flat data
        # (real elements only), using the same shifts as the kernel.
        xr = p_flat[n_main:].astype(jnp.float32) - shift_x
        yr = t_flat[n_main:].astype(jnp.float32) - shift_y
        s = s + jnp.stack([
            jnp.sum(xr), jnp.sum(yr),
            jnp.sum(xr * xr), jnp.sum(yr * yr), jnp.sum(xr * yr),
        ])

    return _finalize(s, n)


# ----------------------------------------------------------------------------
# Wrapper
# ----------------------------------------------------------------------------
def plcc_loss(pred, target, *, tile_rows=None, small_path_max_elems=1 << 20):
    """Pallas implementation of PlccLoss.forward (returns a scalar)."""
    n = int(pred.size)
    if n != int(target.size):
        raise ValueError("input and target must have the same length")
    if n < 2:
        raise ValueError("input length must greater than 2")

    # Keep native dtype; cast per-tile inside the kernel (f32 accumulation).
    p = pred.reshape(-1)
    t = target.reshape(-1)

    if tile_rows is None:
        # ~4 MiB per input block, dtype-aware (8192 rows f32, 16384 bf16).
        itemsize = jnp.dtype(pred.dtype).itemsize
        tile_rows = max(_SUBLANES,
                        min(32768, (4 * 1024 * 1024) // (_LANES * itemsize)))

    if n <= small_path_max_elems:
        return _plcc_small(p, t, n)
    return _plcc_tiled(p, t, n, tile_rows)


# ----------------------------------------------------------------------------
# Pure-JAX reference (mirrors the PyTorch module exactly).
# ----------------------------------------------------------------------------
def _plcc_loss_ref(pred, target):
    x = pred.reshape(-1).astype(jnp.float32)
    y = target.reshape(-1).astype(jnp.float32)
    xm = x - jnp.mean(x)
    ym = y - jnp.mean(y)
    normxm = jnp.linalg.norm(xm) + 1e-8
    normym = jnp.linalg.norm(ym) + 1e-8
    r = jnp.dot(xm / normxm, ym / normym)
    return jnp.log(1.0 - r)


if __name__ == "__main__":
    key = jax.random.PRNGKey(0)
    k1, k2, k3, k4 = jax.random.split(key, 4)

    # 1) Small case (single-block fast path), typical module usage.
    pred = jax.random.normal(k1, (2, 4, 16, 16), dtype=jnp.float32)
    target = jax.random.normal(k2, (2, 4, 16, 16), dtype=jnp.float32)
    loss = jax.block_until_ready(plcc_loss(pred, target))
    ref = jax.block_until_ready(_plcc_loss_ref(pred, target))
    assert jnp.allclose(loss, ref, rtol=2e-5, atol=2e-5), (loss, ref)

    # 2) Tiled-path smoke test at small shape (forced): multi-step grid
    #    accumulation with the shift rows, no ragged tail, no padding.
    loss_t = jax.block_until_ready(
        plcc_loss(pred, target, tile_rows=8, small_path_max_elems=0))
    assert jnp.allclose(loss_t, ref, rtol=1e-4, atol=1e-4), (loss_t, ref)

    # 3) Larger, non-lane-aligned case: tiled path + single lane-pad + plain-JAX
    #    ragged tail. Correlated target -> non-trivial r.
    shape = (2, 3, 499, 501)
    pred_l = jax.random.normal(k3, shape, dtype=jnp.float32)
    target_l = 0.3 * pred_l + jax.random.normal(k4, shape, dtype=jnp.float32)
    loss_l = jax.block_until_ready(plcc_loss(pred_l, target_l))
    ref_l = jax.block_until_ready(_plcc_loss_ref(pred_l, target_l))
    assert jnp.allclose(loss_l, ref_l, rtol=1e-4, atol=1e-4), (loss_l, ref_l)

    print("KERNEL_OK")
</pallas_src>

<mosaic_0001>
module attributes {stable_mosaic.version = 11 : i64} {
  func.func @_plcc_small_kernel(%arg0: memref<16x128xf32, #tpu.memory_space<vmem>>, %arg1: memref<16x128xf32, #tpu.memory_space<vmem>>, %arg2: memref<1x1xf32, #tpu.memory_space<smem>>) attributes {dimension_semantics = [], scalar_prefetch = 0 : i64, scratch_operands = 0 : i64, tpu.core_type = #tpu.core_type<tc>} {
    %c0 = arith.constant 0 : index
    %c0_0 = arith.constant 0 : index
    %0 = vector.load %arg0[%c0, %c0_0] : memref<16x128xf32, #tpu.memory_space<vmem>>, vector<16x128xf32>
    %c0_1 = arith.constant 0 : index
    %c0_2 = arith.constant 0 : index
    %1 = vector.load %arg1[%c0_1, %c0_2] : memref<16x128xf32, #tpu.memory_space<vmem>>, vector<16x128xf32>
    %2 = vector.shape_cast %0 : vector<16x128xf32> to vector<1x16x128xf32>
    %cst = arith.constant dense<0.000000e+00> : vector<1xf32>
    %3 = vector.multi_reduction <add>, %2, %cst [1, 2] : vector<1x16x128xf32> to vector<1xf32>
    %4 = vector.shape_cast %3 : vector<1xf32> to vector<1x1x1xf32>
    %5 = vector.extract %4[0, 0, 0] : f32 from vector<1x1x1xf32>
    %cst_3 = arith.constant 4.8828125E-4 : f32
    %6 = arith.mulf %5, %cst_3 : f32
    %7 = vector.shape_cast %1 : vector<16x128xf32> to vector<1x16x128xf32>
    %cst_4 = arith.constant dense<0.000000e+00> : vector<1xf32>
    %8 = vector.multi_reduction <add>, %7, %cst_4 [1, 2] : vector<1x16x128xf32> to vector<1xf32>
    %9 = vector.shape_cast %8 : vector<1xf32> to vector<1x1x1xf32>
    %10 = vector.extract %9[0, 0, 0] : f32 from vector<1x1x1xf32>
    %cst_5 = arith.constant 4.8828125E-4 : f32
    %11 = arith.mulf %10, %cst_5 : f32
    %12 = vector.broadcast %6 : f32 to vector<16x128xf32>
    %13 = arith.subf %0, %12 : vector<16x128xf32>
    %14 = vector.broadcast %11 : f32 to vector<16x128xf32>
    %15 = arith.subf %1, %14 : vector<16x128xf32>
    %16 = arith.mulf %13, %13 : vector<16x128xf32>
    %17 = vector.shape_cast %16 : vector<16x128xf32> to vector<1x16x128xf32>
    %cst_6 = arith.constant dense<0.000000e+00> : vector<1xf32>
    %18 = vector.multi_reduction <add>, %17, %cst_6 [1, 2] : vector<1x16x128xf32> to vector<1xf32>
    %19 = vector.shape_cast %18 : vector<1xf32> to vector<1x1x1xf32>
    %20 = vector.extract %19[0, 0, 0] : f32 from vector<1x1x1xf32>
    %cst_7 = arith.constant 0.000000e+00 : f32
    %21 = arith.mulf %cst_7, %6 : f32
    %22 = arith.mulf %21, %6 : f32
    %23 = arith.subf %20, %22 : f32
    %cst_8 = arith.constant 0.000000e+00 : f32
    %24 = arith.maximumf %23, %cst_8 : f32
    %25 = arith.mulf %15, %15 : vector<16x128xf32>
    %26 = vector.shape_cast %25 : vector<16x128xf32> to vector<1x16x128xf32>
    %cst_9 = arith.constant dense<0.000000e+00> : vector<1xf32>
    %27 = vector.multi_reduction <add>, %26, %cst_9 [1, 2] : vector<1x16x128xf32> to vector<1xf32>
    %28 = vector.shape_cast %27 : vector<1xf32> to vector<1x1x1xf32>
    %29 = vector.extract %28[0, 0, 0] : f32 from vector<1x1x1xf32>
    %cst_10 = arith.constant 0.000000e+00 : f32
    %30 = arith.mulf %cst_10, %11 : f32
    %31 = arith.mulf %30, %11 : f32
    %32 = arith.subf %29, %31 : f32
    %cst_11 = arith.constant 0.000000e+00 : f32
    %33 = arith.maximumf %32, %cst_11 : f32
    %34 = arith.mulf %13, %15 : vector<16x128xf32>
    %35 = vector.shape_cast %34 : vector<16x128xf32> to vector<1x16x128xf32>
    %cst_12 = arith.constant dense<0.000000e+00> : vector<1xf32>
    %36 = vector.multi_reduction <add>, %35, %cst_12 [1, 2] : vector<1x16x128xf32> to vector<1xf32>
    %37 = vector.shape_cast %36 : vector<1xf32> to vector<1x1x1xf32>
    %38 = vector.extract %37[0, 0, 0] : f32 from vector<1x1x1xf32>
    %cst_13 = arith.constant 0.000000e+00 : f32
    %39 = arith.mulf %cst_13, %6 : f32
    %40 = arith.mulf %39, %11 : f32
    %41 = arith.subf %38, %40 : f32
    %42 = math.sqrt %24 : f32
    %cst_14 = arith.constant 9.99999993E-9 : f32
    %43 = arith.addf %42, %cst_14 : f32
    %44 = math.sqrt %33 : f32
    %cst_15 = arith.constant 9.99999993E-9 : f32
    %45 = arith.addf %44, %cst_15 : f32
    %46 = arith.mulf %43, %45 : f32
    %47 = arith.divf %41, %46 : f32
    %cst_16 = arith.constant 1.000000e+00 : f32
    %48 = arith.subf %cst_16, %47 : f32
    %49 = math.log %48 : f32
    %c0_17 = arith.constant 0 : index
    %c0_18 = arith.constant 0 : index
    %50 = memref.load %arg2[%c0_17, %c0_18] : memref<1x1xf32, #tpu.memory_space<smem>>
    memref.store %49, %arg2[%c0_17, %c0_18] : memref<1x1xf32, #tpu.memory_space<smem>>
    return
  }
}

</mosaic_0001>

<bundles_post_ra>
// kernel: tpu_custom_call.1
= control target key start
LH: loop header
LB: loop body
LE: loop exit
PB: predicated region body
PF: predicated region fallthrough
CT: control target
= control target key end

     0   :  { %7 = vsyncpa [#allocation3], 0  ;;  %s338_s0 = inlined_call_operand.hbm [shape: f32[16,128], index: 0, kind: input, shape index: {}]   ;;  %s339_s1 = inlined_call_operand.hbm [shape: f32[16,128], index: 1, kind: input, shape index: {}]   ;;  %s340_s2 = inlined_call_operand.hbm [shape: f32[1,1], index: 2, kind: output, shape index: {}]  }
   0x1   :  { %8 = vsyncpa [#allocation6], 0 }
   0x2   :  { %9 = vsyncpa [#allocation4], 0  ;;  %s257_s9 = smov [#allocation2]   ;;  %s197_s13 = scalar_lea.hbm %s338_s0, 256 }
   0x3   :  { %s15_s10 = sshll.u32 %s257_s9, 4  ;;  %p198_p0 = scmp.ne.s32.totalorder %s338_s0, %s197_s13  ;;  %s16_s10 = int_to_ptr.vmem [resolvable:$true] %s15_s10 }
   0x4   :  { %p201_p1 = scmp.lt.u32.totalorder %s197_s13, %s338_s0 }
   0x6   :  { %p203_p2 = pnand %p201_p1, %p198_p0 }
   0x8   :  { %206 = shalt.err (!%p203_p2)
}
   0x9   :  { %s207_s18 = scalar_lea.vmem %s16_s10, 256  ;;  %p212_p4 = scmp.lt.s32.totalorder %s16_s10, %s16_s10 }
   0xa   :  { %p208_p3 = scmp.ne.s32.totalorder %s16_s10, %s207_s18  ;;  %p213_p5 = scmp.lt.s32.totalorder %s207_s18, %s207_s18 }
   0xc   :  { %p214_p6 = por %p213_p5, %p212_p4 }
   0xe   :  { %p215_p7 = pnand %p214_p6, %p208_p3 }
  0x10   :  { %218 = shalt.err (!%p215_p7)
}
  0x11   :  { %s258_s19 = smov 128   ;;  %s259_s20 = smov 8  }
  0x12   :  { %21 = dma.hbm_to_vmem [thread:$0]  %s338_s0, 256, %s16_s10, [#allocation3], %s258_s19, %s258_s19, %s259_s20  }
  0x13   :  { %s260_s23 = smov [#allocation5]   ;;  %s219_s27 = scalar_lea.hbm %s339_s1, 256 }
  0x14   :  { %s27_s24 = sshll.u32 %s260_s23, 4  ;;  %p220_p8 = scmp.ne.s32.totalorder %s339_s1, %s219_s27  ;;  %s28_s24 = int_to_ptr.vmem [resolvable:$true] %s27_s24 }
  0x15   :  { %p223_p9 = scmp.lt.u32.totalorder %s219_s27, %s339_s1 }
  0x17   :  { %p225_p10 = pnand %p223_p9, %p220_p8 }
  0x19   :  { %228 = shalt.err (!%p225_p10)
}
  0x1a   :  { %s229_s4 = scalar_lea.vmem %s28_s24, 256  ;;  %p234_p12 = scmp.lt.s32.totalorder %s28_s24, %s28_s24 }
  0x1b   :  { %p230_p11 = scmp.ne.s32.totalorder %s28_s24, %s229_s4  ;;  %p235_p13 = scmp.lt.s32.totalorder %s229_s4, %s229_s4 }
  0x1d   :  { %p236_p0 = por %p235_p13, %p234_p12 }
  0x1f   :  { %p237_p1 = pnand %p236_p0, %p230_p11 }
  0x21   :  { %240 = shalt.err (!%p237_p1)
}
  0x22   :  { %33 = dma.hbm_to_vmem [thread:$0]  %s339_s1, 256, %s28_s24, [#allocation6], %s258_s19, %s258_s19, %s259_s20  }
  0x23   :  { %251 = dma.done.wait [#allocation3], 256  }
  0x24   :  { %252 = vsyncadd [#allocation3], 4294967040 }
  0x25   :  { %253 = dma.done.wait [#allocation6], 256  }
  0x26   :  { %254 = vsyncadd [#allocation6], 4294967040  ;;  %v40_v0 = vld [vmem:[#allocation2] sm:$0xff]  ;;  %v41_v1 = vld [vmem:[#allocation2 + $0x8] sm:$0xff]  ;;  %s261_s15 = smov 0.0   ;;  %s241_s5 = scalar_lea.hbm %s340_s2, 16 }
  0x27   :  { %v42_v2 = vld [vmem:[#allocation5] sm:$0xff]  ;;  %v44_v3 = vadd.f32 %v41_v1, %v40_v0  ;;  %v43_v4 = vld [vmem:[#allocation5 + $0x8] sm:$0xff]  ;;  %p242_p2 = scmp.ne.s32.totalorder %s340_s2, %s241_s5  ;;  %p245_p3 = scmp.lt.u32.totalorder %s241_s5, %s340_s2 }
  0x28   :  { %v55_v5 = vadd.f32 %v43_v4, %v42_v2 }
  0x29   :  { %45 = vadd.xlane.f32.xlu0 %v44_v3  ;;  %p247_p4 = pnand %p245_p3, %p242_p2 }
  0x2d   :  { %56 = vadd.xlane.f32.xlu0 %v55_v5 }
  0xb6   :  { %v46_v6 = vpop.xlane.xlu0 %45 }
  0xb7   :  { %v47_v7 = vrot.slane %v46_v6, 4 }
  0xb9   :  { %v48_v8 = vadd.f32 %v47_v7, %v46_v6 }
  0xba   :  { %v57_v9 = vpop.xlane.xlu0 %56 }
  0xbb   :  { %v49_v10 = vrot.slane %v48_v8, 2  ;;  %v58_v11 = vrot.slane %v57_v9, 4 }
  0xbd   :  { %v59_v12 = vadd.f32 %v58_v11, %v57_v9  ;;  %v50_v13 = vadd.f32 %v49_v10, %v48_v8 }
  0xbf   :  { %v60_v14 = vrot.slane %v59_v12, 2  ;;  %v51_v15 = vrot.slane %v50_v13, 1 }
  0xc1   :  { %v52_v16 = vadd.f32 %v51_v15, %v50_v13  ;;  %v61_v17 = vadd.f32 %v60_v14, %v59_v12 }
  0xc3   :  { %165 = vpush %v52_v16  ;;  %v62_v18 = vrot.slane %v61_v17, 1 }
  0xc5   :  { %v63_v19 = vadd.f32 %v62_v18, %v61_v17 }
  0xc7   :  { %167 = vpush %v63_v19 }
  0xf4   :  { %s166_s1 = spop %165 }
  0xf5   :  { %s302_s6 = smul.f32 0.00048828125, %s166_s1 }
  0xf7   :  { %v66_v20 = vstv %s302_s6  ;;  %s84_s9 = smul.f32 0.0, %s302_s6 }
  0xf8   :  { %s168_s7 = spop %167  ;;  %v67_v21 = vsub.f32 %v40_v0, %v66_v20  ;;  %v68_v22 = vsub.f32 %v41_v1, %v66_v20 }
  0xf9   :  { %s305_s8 = smul.f32 0.00048828125, %s168_s7 }
  0xfa   :  { %v72_v23 = vmul.f32 %v67_v21, %v67_v21  ;;  %v73_v24 = vmul.f32 %v68_v22, %v68_v22  ;;  %s85_s11 = smul.f32 %s84_s9, %s302_s6 }
  0xfb   :  { %v69_v25 = vstv %s305_s8  ;;  %s312_s10 = smul.f32 %s84_s9, %s305_s8 }
  0xfc   :  { %v74_v26 = vadd.f32 %v73_v24, %v72_v23  ;;  %v70_v27 = vsub.f32 %v42_v2, %v69_v25  ;;  %v71_v28 = vsub.f32 %v43_v4, %v69_v25  ;;  %s100_s12 = smul.f32 0.0, %s305_s8 }
  0xfe   :  { %75 = vadd.xlane.f32.xlu1 %v74_v26  ;;  %v104_v29 = vmul.f32 %v70_v27, %v67_v21  ;;  %v105_v30 = vmul.f32 %v71_v28, %v68_v22  ;;  %v88_v31 = vmul.f32 %v70_v27, %v70_v27  ;;  %v89_v32 = vmul.f32 %v71_v28, %v71_v28  ;;  %s101_s17 = smul.f32 %s100_s12, %s305_s8 }
 0x100   :  { %v106_v33 = vadd.f32 %v105_v30, %v104_v29  ;;  %v90_v34 = vadd.f32 %v89_v32, %v88_v31 }
 0x102   :  { %107 = vadd.xlane.f32.xlu0 %v106_v33  ;;  %91 = vadd.xlane.f32.xlu1 %v90_v34 }
 0x18b   :  { %v76_v35 = vpop.xlane.xlu1 %75 }
 0x18c   :  { %v77_v36 = vrot.slane %v76_v35, 4 }
 0x18e   :  { %v78_v37 = vadd.f32 %v77_v36, %v76_v35 }
 0x18f   :  { %v108_v38 = vpop.xlane.xlu0 %107  ;;  %v92_v39 = vpop.xlane.xlu1 %91 }
 0x190   :  { %v79_v40 = vrot.slane %v78_v37, 2  ;;  %v109_v41 = vrot.slane %v108_v38, 4  ;;  %v93_v42 = vrot.slane %v92_v39, 4 }
 0x192   :  { %v110_v43 = vadd.f32 %v109_v41, %v108_v38  ;;  %v94_v44 = vadd.f32 %v93_v42, %v92_v39  ;;  %v80_v45 = vadd.f32 %v79_v40, %v78_v37 }
 0x194   :  { %v111_v46 = vrot.slane %v110_v43, 2  ;;  %v95_v47 = vrot.slane %v94_v44, 2  ;;  %v81_v48 = vrot.slane %v80_v45, 1 }
 0x196   :  { %v112_v49 = vadd.f32 %v111_v46, %v110_v43  ;;  %v96_v50 = vadd.f32 %v95_v47, %v94_v44  ;;  %v82_v51 = vadd.f32 %v81_v48, %v80_v45 }
 0x198   :  { %169 = vpush %v82_v51  ;;  %v97_v52 = vrot.slane %v96_v50, 1  ;;  %v113_v53 = vrot.slane %v112_v49, 1 }
 0x19a   :  { %v98_v54 = vadd.f32 %v97_v52, %v96_v50  ;;  %v114_v55 = vadd.f32 %v113_v53, %v112_v49 }
 0x19c   :  { %171 = vpush %v98_v54 }
 0x19d   :  { %173 = vpush %v114_v55 }
 0x1c9   :  { %s170_s13 = spop %169 }
 0x1ca   :  { %s86_s14 = ssub.f32 %s170_s13, %s85_s11 }
 0x1cc   :  { %s87_s16 = smax.f32 %s261_s15, %s86_s14 }
 0x1cd   :  { %v118_v56 = vstv %s87_s16  ;;  %s172_s18 = spop %171 }
 0x1ce   :  { %189 = vrsqrt.f32 %v118_v56  ;;  %s102_s19 = ssub.f32 %s172_s18, %s101_s17  ;;  %s319_s20 = spop %173  ;;  %vm121_vm0 = vcmp.eq.f32.partialorder %v118_v56, inf  ;;  %v124_v60 = vand.u32 2147483648, %v118_v56  ;;  %vm123_vm1 = vcmp.eq.f32.partialorder %v118_v56, 0.0 }
 0x1cf   :  { %s117_s21 = ssub.f32 %s319_s20, %s312_s10 }
 0x1d0   :  { %s103_s22 = smax.f32 %s261_s15, %s102_s19 }
 0x1d1   :  { %v128_v57 = vstv %s103_s22 }
 0x1d2   :  { %191 = vrsqrt.f32 %v128_v57  ;;  %vm131_vm2 = vcmp.eq.f32.partialorder %v128_v57, inf  ;;  %v134_v1 = vand.u32 2147483648, %v128_v57  ;;  %vm133_vm3 = vcmp.eq.f32.partialorder %v128_v57, 0.0 }
 0x1d8   :  { %v190_v58 = vpop.eup %189 }
 0x1d9   :  { %v120_v59 = vmul.f32 %v190_v58, %v118_v56 }
 0x1db   :  { %v122_v61 = vsel %vm121_vm0, %v118_v56, %v120_v59 }
 0x1dc   :  { %v192_v62 = vpop.eup %191  ;;  %v125_v63 = vsel %vm123_vm1, %v124_v60, %v122_v61 }
 0x1dd   :  { %175 = vpush %v125_v63  ;;  %v130_v0 = vmul.f32 %v192_v62, %v128_v57 }
 0x1df   :  { %v132_v2 = vsel %vm131_vm2, %v128_v57, %v130_v0 }
 0x1e0   :  { %v135_v3 = vsel %vm133_vm3, %v134_v1, %v132_v2 }
 0x1e1   :  { %177 = vpush %v135_v3 }
 0x20e   :  { %s176_s23 = spop %175 }
 0x20f   :  { %s127_s24 = sadd.f32 1e-08, %s176_s23 }
 0x212   :  { %s178_s25 = spop %177 }
 0x213   :  { %s137_s26 = sadd.f32 1e-08, %s178_s25 }
 0x215   :  { %s138_s27 = smul.f32 %s137_s26, %s127_s24 }
 0x217   :  { %v139_v4 = vstv %s138_s27 }
 0x218   :  { %193 = vrcp.f32 %v139_v4 }
 0x222   :  { %v194_v5 = vpop.eup %193 }
 0x223   :  { %179 = vpush %v194_v5 }
 0x254   :  { %s180_s28 = spop %179 }
 0x255   :  { %s142_s29 = smul.f32 %s180_s28, %s117_s21 }
 0x257   :  { %s143_s30 = ssub.f32 1.0, %s142_s29 }
 0x259   :  { %v144_v6 = vstv %s143_s30 }
 0x25a   :  { %195 = vlog2.f32 %v144_v6 }
 0x264   :  { %v196_v7 = vpop.eup %195 }
 0x265   :  { %v146_v8 = vmul.f32 0.6931472, %v196_v7 }
 0x267   :  { %181 = vpush %v146_v8 }
 0x298   :  { %s182_s3 = spop %181 }
 0x299   :  { %149 = sst [smem:[#allocation7]] %s182_s3 }
 0x29a   :  { %250 = shalt.err (!%p247_p4)
}
 0x29b   :  { %s262_s9 = smov [#allocation7]  }
 0x29c   :  { %157 = dma.smem_to_hbm %s262_s9, 16, %s340_s2, [#allocation4]  }
 0x29d   :  { %255 = dma.done.wait [#allocation4], 16  }
 0x29e   :  { %256 = vsyncadd [#allocation4], 4294967280 }
 0x29f   :  { %161 = sfence }
 0x2a0   :  { %162 = vsyncpa [#allocation3], 1 }
 0x2a1   :  { %163 = vsyncpa [#allocation6], 1 }
 0x2a2   :  { %164 = vsyncpa [#allocation4], 1 }

</bundles_post_ra>
